<compile_context>
chip_gen: v7x
topology: tpu7x:2x2x1
jax: 0.10.0
libtpu: 0.0.40
codegen_flags: <defaults>
</compile_context>

<pallas_src>
import jax
import jax.numpy as jnp
import numpy as np
from jax.experimental import pallas as pl
from jax.experimental.pallas import tpu as pltpu

N_EMB_ACTIONS = 5   # nn.Embedding(5, 32)
EMB_DIM = 32        # goal / prev-action embedding width
HIDDEN = 128        # hidden_size (kept small; 512 in the default ctor)
GOAL_DIM = 2        # pointgoal sensor dim
N_ACTIONS = 4       # action_space.n

# fused input layout (lanes of the in-kernel x slab / rows of w_in)
IN_W = 8                                     # [goal(2) | onehot(5) | 1]
BIAS_COL = GOAL_DIM + N_EMB_ACTIONS          # 7 (constant 1.0 -> bias row)

# fused head layout (lanes of the head matmul / scalar half of the output)
HEAD_W = 128
VALUE_LANE = 0        # critic output lands here directly from the matmul
LOGP_LANE = 1         # overwritten with log-prob of the chosen action
ACTION_LANE = 2       # overwritten with the chosen action (as f32)
LOGIT0 = 8            # logits occupy lanes [LOGIT0, LOGIT0 + N_ACTIONS)
SLAB_W = HIDDEN + HEAD_W   # output slab: [h_new(128) | head/scalars(128)]


def _policy_kernel(goal_ref, prev_ref, mask_ref, h0_ref, win_ref, wbig_ref,
                   out_ref, h_sc):
    H = HIDDEN
    t = pl.program_id(0)
    N = goal_ref.shape[1]

    # hidden state stays resident in VMEM across the whole T-step segment
    @pl.when(t == 0)
    def _():
        h_sc[...] = h0_ref[...]

    goal = goal_ref[0]                                   # (N, 2) f32
    mask = mask_ref[0]                                   # (N, 1) f32
    pa = prev_ref[0]                                     # (N, 1) int32

    # ---- in-kernel input packing: [goal | onehot((pa+1)*mask) | 1] ----------
    idx = ((pa.astype(jnp.float32) + 1.0) * mask).astype(jnp.int32)   # (N, 1)
    lane8 = jax.lax.broadcasted_iota(jnp.int32, (N, IN_W), 1)
    x = jnp.where(lane8 == (GOAL_DIM + idx), 1.0, 0.0)                # one-hot
    x = x + jnp.where(lane8 == BIAS_COL, 1.0, 0.0)                    # bias lane
    x = x + jnp.where(lane8 == 0, goal[:, 0:1], 0.0)
    x = x + jnp.where(lane8 == 1, goal[:, 1:2], 0.0)                  # (N, 8)

    # ---- fused input -> gates (goal-embed, action-embed, biases folded, f32)
    gi = jnp.dot(x, win_ref[...], preferred_element_type=jnp.float32)  # (N,3H)

    # ---- masked hidden state + recurrent gates (bf16 MXU, f32 accumulate) ----
    h = mask * h_sc[...]                                 # (N, H) f32
    gh = (jnp.dot(h.astype(wbig_ref.dtype), wbig_ref[0:H, 0:3 * H],
                  preferred_element_type=jnp.float32)
          + wbig_ref[H:H + 1, 0:3 * H].astype(jnp.float32))   # (N, 3H)

    # PyTorch GRU gate order: r, z, n (b_hn stays inside the r-product; b_hr,
    # b_hz were folded into gi's f32 bias row host-side)
    r = jax.nn.sigmoid(gi[:, 0:H] + gh[:, 0:H])
    z = jax.nn.sigmoid(gi[:, H:2 * H] + gh[:, H:2 * H])
    n = jnp.tanh(gi[:, 2 * H:3 * H] + r * gh[:, 2 * H:3 * H])
    h_new = (1.0 - z) * n + z * h                        # (N, H) f32
    h_sc[...] = h_new

    # ---- fused critic + actor head (single lane-dense 128-wide matmul) ------
    head = (jnp.dot(h_new.astype(wbig_ref.dtype),
                    wbig_ref[0:H, 3 * H:3 * H + HEAD_W],
                    preferred_element_type=jnp.float32)
            + wbig_ref[H:H + 1, 3 * H:3 * H + HEAD_W].astype(jnp.float32))

    # ---- deterministic action + log-prob over full 128 lanes (masked) -------
    lane = jax.lax.broadcasted_iota(jnp.int32, head.shape, 1)
    is_logit = jnp.logical_and(lane >= LOGIT0, lane < LOGIT0 + N_ACTIONS)
    logits_m = jnp.where(is_logit, head, -jnp.inf)
    m = jnp.max(logits_m, axis=-1, keepdims=True)
    s = jnp.sum(jnp.exp(logits_m - m), axis=-1, keepdims=True)
    logp = -jnp.log(s)                                   # chosen logit == m
    amax = jnp.min(jnp.where(logits_m == m, lane, HEAD_W),
                   axis=-1, keepdims=True)               # first-occurrence argmax
    action_f = (amax - LOGIT0).astype(jnp.float32)

    # scalar half of the output = head with two lanes overwritten
    # (value already sits on VALUE_LANE straight out of the matmul)
    slab = jnp.where(lane == LOGP_LANE, logp, head)
    slab = jnp.where(lane == ACTION_LANE, action_f, slab)

    out_ref[0, :, 0:H] = h_new
    out_ref[0, :, H:H + HEAD_W] = slab


@jax.jit
def policy_act_rollout(fused, goal, prev_actions, masks, rnn_hidden_states):
    """T repeated Policy.act(..., deterministic=True) steps (blind GRU policy).

    goal (T,N,2) f32 | prev_actions (T,N,1) int | masks (T,N,1) f32 |
    rnn_hidden_states (1,N,H).  Returns (values (T,N,1), actions (T,N,1) int,
    log_probs (T,N,1), new_hidden (1,N,H)).  T=1 == original Policy.act.
    """
    T, N, _ = goal.shape
    H = rnn_hidden_states.shape[-1]
    h0 = rnn_hidden_states.reshape(N, H)
    w_in, w_big = fused["w_in"], fused["w_big"]

    flops = 2 * T * N * (IN_W * 3 * H + H * 3 * H + H * HEAD_W)
    transcendentals = T * N * (3 * H + HEAD_W + 2)
    bytes_accessed = (w_in.size * 4 + w_big.size * 2 + h0.size * 4
                      + T * N * (GOAL_DIM * 4 + 4 + 4 + SLAB_W * 4))

    out = pl.pallas_call(
        _policy_kernel,
        out_shape=jax.ShapeDtypeStruct((T, N, SLAB_W), jnp.float32),
        grid=(T,),
        in_specs=[
            pl.BlockSpec((1, N, GOAL_DIM), lambda t: (t, 0, 0)),
            pl.BlockSpec((1, N, 1), lambda t: (t, 0, 0)),
            pl.BlockSpec((1, N, 1), lambda t: (t, 0, 0)),
            pl.BlockSpec((N, H), lambda t: (0, 0)),              # h0 (resident)
            pl.BlockSpec((IN_W, 3 * H), lambda t: (0, 0)),       # w_in (resident)
            pl.BlockSpec((H + 8, 3 * H + HEAD_W), lambda t: (0, 0)),  # w_big
        ],
        out_specs=pl.BlockSpec((1, N, SLAB_W), lambda t: (t, 0, 0)),
        scratch_shapes=[pltpu.VMEM((N, H), jnp.float32)],
        compiler_params=pltpu.CompilerParams(
            dimension_semantics=("arbitrary",)),
        cost_estimate=pl.CostEstimate(flops=flops,
                                      transcendentals=transcendentals,
                                      bytes_accessed=bytes_accessed),
    )(goal, prev_actions.astype(jnp.int32), masks, h0, w_in, w_big)

    h_seq = out[:, :, 0:H]
    value = out[:, :, H + VALUE_LANE:H + VALUE_LANE + 1]
    logp = out[:, :, H + LOGP_LANE:H + LOGP_LANE + 1]
    action = out[:, :, H + ACTION_LANE:H + ACTION_LANE + 1].astype(jnp.int32)
    return value, action, logp, h_seq[-1].reshape(1, N, H)


def policy_act(fused, goal, prev_actions, masks, rnn_hidden_states):
    """Single-step Policy.act(..., deterministic=True) interface (T=1)."""
    v, a, lp, h = policy_act_rollout(fused, goal[None], prev_actions[None],
                                     masks[None], rnn_hidden_states)
    return v[0], a[0], lp[0], h


def make_params(key):
    """Raw (unfused) parameters, stored (in_features, out_features)."""
    ks = jax.random.split(key, 9)

    def init(k, shape, fan_in):
        return jax.random.normal(k, shape, jnp.float32) / jnp.sqrt(fan_in)

    H = HIDDEN
    return {
        "wt":  init(ks[0], (GOAL_DIM, EMB_DIM), GOAL_DIM),      # tgt_embed
        "bt":  jnp.zeros((1, EMB_DIM), jnp.float32),
        "emb": init(ks[1], (N_EMB_ACTIONS, EMB_DIM), 1.0),      # Embedding(5,32)
        "wih": init(ks[2], (2 * EMB_DIM, 3 * H), 2 * EMB_DIM),  # GRU (in, 3H), r|z|n
        "bih": init(ks[3], (1, 3 * H), H),
        "whh": init(ks[4], (H, 3 * H), H),
        "bhh": init(ks[5], (1, 3 * H), H),
        "wc":  init(ks[6], (H, 1), H),                          # critic_linear
        "bc":  jnp.zeros((1, 1), jnp.float32),
        "wa":  init(ks[7], (H, N_ACTIONS), H),                  # CategoricalNet
        "ba":  jnp.zeros((1, N_ACTIONS), jnp.float32),
    }


def fuse_params(p, big_weight_dtype=jnp.bfloat16):
    """One-time host-side weight fusion (free per step).

    w_in  (8, 3H)  f32 : [goal-proj(2) | action-embed-proj(5) | bias row],
                          with b_ih and b_hr/b_hz folded into the bias row.
    w_big (H+8, 3H+128) bf16 : [ W_hh | fused head ], row H = [b_hn | head bias],
                          critic column on VALUE_LANE, actor on LOGIT0:+4.
    """
    H = HIDDEN
    wih_goal = p["wih"][0:EMB_DIM, :]                 # (32, 3H)
    wih_act = p["wih"][EMB_DIM:2 * EMB_DIM, :]        # (32, 3H)
    w_goal = p["wt"] @ wih_goal                       # (2, 3H)
    w_act = p["emb"] @ wih_act                        # (5, 3H)
    b_in = p["bt"] @ wih_goal + p["bih"]              # (1, 3H)
    # fold b_hr, b_hz into the f32 input-side bias (b_hn must stay on gh side)
    b_in = b_in.at[:, 0:2 * H].add(p["bhh"][:, 0:2 * H])

    w_in = jnp.zeros((IN_W, 3 * H), jnp.float32)
    w_in = w_in.at[0:GOAL_DIM].set(w_goal)
    w_in = w_in.at[GOAL_DIM:GOAL_DIM + N_EMB_ACTIONS].set(w_act)
    w_in = w_in.at[BIAS_COL].set(b_in[0])             # "ones" lane -> bias

    hoff = 3 * H
    w_big = jnp.zeros((H + 8, 3 * H + HEAD_W), jnp.float32)
    w_big = w_big.at[0:H, 0:3 * H].set(p["whh"])
    w_big = w_big.at[H, 2 * H:3 * H].set(p["bhh"][0, 2 * H:3 * H])     # b_hn only
    w_big = w_big.at[0:H, hoff + VALUE_LANE].set(p["wc"][:, 0])        # critic col
    w_big = w_big.at[0:H, hoff + LOGIT0:hoff + LOGIT0 + N_ACTIONS].set(p["wa"])
    w_big = w_big.at[H, hoff + VALUE_LANE].set(p["bc"][0, 0])
    w_big = w_big.at[H, hoff + LOGIT0:hoff + LOGIT0 + N_ACTIONS].set(p["ba"][0])

    return {"w_in": w_in, "w_big": w_big.astype(big_weight_dtype)}


def policy_act_rollout_ref(fused, goal, prev_actions, masks, rnn_hidden_states):
    """Pure-JAX reference using the same fused weights / mixed precision."""
    T, N, _ = goal.shape
    H = rnn_hidden_states.shape[-1]
    h = rnn_hidden_states.reshape(N, H)
    w_in, w_big = fused["w_in"], fused["w_big"]
    hoff = 3 * H
    values, actions, logps = [], [], []
    for t in range(T):
        g, pa, mask = goal[t], prev_actions[t], masks[t]
        idx = ((pa.astype(jnp.float32) + 1.0) * mask).astype(jnp.int32)
        onehot = (idx == jnp.arange(N_EMB_ACTIONS, dtype=jnp.int32)[None, :]
                  ).astype(jnp.float32)
        x = jnp.concatenate([g, onehot, jnp.ones((N, 1), jnp.float32)], axis=1)
        gi = jnp.dot(x, w_in, preferred_element_type=jnp.float32)
        hm = mask * h
        gh = (jnp.dot(hm.astype(w_big.dtype), w_big[0:H, 0:3 * H],
                      preferred_element_type=jnp.float32)
              + w_big[H:H + 1, 0:3 * H].astype(jnp.float32))
        r = jax.nn.sigmoid(gi[:, 0:H] + gh[:, 0:H])
        z = jax.nn.sigmoid(gi[:, H:2 * H] + gh[:, H:2 * H])
        n = jnp.tanh(gi[:, 2 * H:3 * H] + r * gh[:, 2 * H:3 * H])
        h = (1.0 - z) * n + z * hm
        head = (jnp.dot(h.astype(w_big.dtype), w_big[0:H, hoff:hoff + HEAD_W],
                        preferred_element_type=jnp.float32)
                + w_big[H:H + 1, hoff:hoff + HEAD_W].astype(jnp.float32))
        logits = head[:, LOGIT0:LOGIT0 + N_ACTIONS]
        value = head[:, VALUE_LANE:VALUE_LANE + 1]
        logp_all = jax.nn.log_softmax(logits, axis=-1)
        action = jnp.argmax(logits, axis=-1, keepdims=True).astype(jnp.int32)
        logp = jnp.take_along_axis(logp_all, action, axis=-1)
        values.append(value), actions.append(action), logps.append(logp)
    return (jnp.stack(values), jnp.stack(actions), jnp.stack(logps),
            h.reshape(1, N, H))


if __name__ == "__main__":
    key = jax.random.PRNGKey(0)
    kp, kg, ka, km, kh = jax.random.split(key, 5)

    fused = fuse_params(make_params(kp))

    T, N = 4, 16   # 4-step rollout segment, 16 envs (fills the bf16 vreg tile)
    goal = jax.random.normal(kg, (T, N, GOAL_DIM), jnp.float32)
    prev_actions = jax.random.randint(ka, (T, N, 1), 0, N_ACTIONS,
                                      dtype=jnp.int32)
    masks = (jax.random.uniform(km, (T, N, 1)) > 0.3).astype(jnp.float32)
    rnn_hidden_states = 0.1 * jax.random.normal(kh, (1, N, HIDDEN), jnp.float32)

    value, action, logp, new_hidden = policy_act_rollout(
        fused, goal, prev_actions, masks, rnn_hidden_states)
    jax.block_until_ready((value, action, logp, new_hidden))

    assert value.shape == (T, N, 1)
    assert action.shape == (T, N, 1)
    assert logp.shape == (T, N, 1)
    assert new_hidden.shape == (1, N, HIDDEN)

    # single-step (original Policy.act interface) smoke test
    v1, a1, lp1, h1 = policy_act(fused, goal[0], prev_actions[0], masks[0],
                                 rnn_hidden_states)
    jax.block_until_ready((v1, a1, lp1, h1))
    assert v1.shape == (N, 1) and a1.shape == (N, 1) and h1.shape == (1, N, HIDDEN)

    # numerical check against the pure-JAX reference (same fused weights)
    v_r, a_r, lp_r, h_r = policy_act_rollout_ref(
        fused, goal, prev_actions, masks, rnn_hidden_states)
    np.testing.assert_allclose(np.asarray(value), np.asarray(v_r),
                               atol=2e-2, rtol=2e-2)
    np.testing.assert_allclose(np.asarray(logp), np.asarray(lp_r),
                               atol=2e-2, rtol=2e-2)
    np.testing.assert_allclose(np.asarray(new_hidden), np.asarray(h_r),
                               atol=2e-2, rtol=2e-2)
    assert np.array_equal(np.asarray(action), np.asarray(a_r))
    np.testing.assert_allclose(np.asarray(v1), np.asarray(v_r[0]),
                               atol=2e-2, rtol=2e-2)

    print("KERNEL_OK")
</pallas_src>

<mosaic_0001>
module attributes {stable_mosaic.version = 11 : i64} {
  func.func @_policy_kernel(%arg0: i32, %arg1: memref<1x16x2xf32, #tpu.memory_space<vmem>>, %arg2: memref<1x16x1xi32, #tpu.memory_space<vmem>>, %arg3: memref<1x16x1xf32, #tpu.memory_space<vmem>>, %arg4: memref<16x128xf32, #tpu.memory_space<vmem>>, %arg5: memref<8x384xf32, #tpu.memory_space<vmem>>, %arg6: memref<136x512xbf16, #tpu.memory_space<vmem>>, %arg7: memref<1x16x256xf32, #tpu.memory_space<vmem>>, %arg8: memref<16x128xf32, #tpu.memory_space<vmem>>) attributes {dimension_semantics = [#tpu.dimension_semantics<arbitrary>], iteration_bounds = array<i64: 4>, scalar_prefetch = 0 : i64, scratch_operands = 1 : i64, tpu.core_type = #tpu.core_type<tc>, window_params = [{transform_indices = @transform_0, window_bounds = array<i64: 1, 16, 2>}, {transform_indices = @transform_1, window_bounds = array<i64: 1, 16, 1>}, {transform_indices = @transform_2, window_bounds = array<i64: 1, 16, 1>}, {pipeline_mode = #tpu.pipeline_mode<synchronous>, transform_indices = @transform_3, window_bounds = array<i64: 16, 128>}, {pipeline_mode = #tpu.pipeline_mode<synchronous>, transform_indices = @transform_4, window_bounds = array<i64: 8, 384>}, {pipeline_mode = #tpu.pipeline_mode<synchronous>, transform_indices = @transform_5, window_bounds = array<i64: 136, 512>}, {transform_indices = @transform_6, window_bounds = array<i64: 1, 16, 256>}]} {
    %c0_i32 = arith.constant 0 : i32
    %0 = arith.cmpi eq, %arg0, %c0_i32 : i32
    %1 = arith.extui %0 : i1 to i32
    %c0_i32_0 = arith.constant 0 : i32
    %2 = arith.cmpi ne, %1, %c0_i32_0 : i32
    scf.if %2 {
      %c0_48 = arith.constant 0 : index
      %c0_49 = arith.constant 0 : index
      %133 = vector.load %arg4[%c0_48, %c0_49] : memref<16x128xf32, #tpu.memory_space<vmem>>, vector<16x128xf32>
      %c0_50 = arith.constant 0 : index
      %c0_51 = arith.constant 0 : index
      %134 = vector.load %arg8[%c0_50, %c0_51] : memref<16x128xf32, #tpu.memory_space<vmem>>, vector<16x128xf32>
      tpu.vector_store %arg8[%c0_50, %c0_51], %133 {strides = array<i32>} : memref<16x128xf32, #tpu.memory_space<vmem>>, vector<16x128xf32>,
    } else {
    }
    %c0 = arith.constant 0 : index
    %c0_1 = arith.constant 0 : index
    %c0_2 = arith.constant 0 : index
    %3 = vector.load %arg1[%c0, %c0_1, %c0_2] : memref<1x16x2xf32, #tpu.memory_space<vmem>>, vector<1x16x2xf32>
    %4 = vector.shape_cast %3 : vector<1x16x2xf32> to vector<16x2xf32>
    %c0_3 = arith.constant 0 : index
    %c0_4 = arith.constant 0 : index
    %c0_5 = arith.constant 0 : index
    %5 = vector.load %arg3[%c0_3, %c0_4, %c0_5] : memref<1x16x1xf32, #tpu.memory_space<vmem>>, vector<1x16x1xf32>
    %6 = vector.shape_cast %5 : vector<1x16x1xf32> to vector<16x1xf32>
    %c0_6 = arith.constant 0 : index
    %c0_7 = arith.constant 0 : index
    %c0_8 = arith.constant 0 : index
    %7 = vector.load %arg2[%c0_6, %c0_7, %c0_8] : memref<1x16x1xi32, #tpu.memory_space<vmem>>, vector<1x16x1xi32>
    %8 = vector.shape_cast %7 : vector<1x16x1xi32> to vector<16x1xi32>
    %9 = arith.sitofp %8 : vector<16x1xi32> to vector<16x1xf32>
    %cst = arith.constant 1.000000e+00 : f32
    %10 = vector.broadcast %cst : f32 to vector<16x1xf32>
    %11 = arith.addf %9, %10 : vector<16x1xf32>
    %12 = arith.mulf %11, %6 : vector<16x1xf32>
    %13 = arith.fptosi %12 : vector<16x1xf32> to vector<16x1xi32>
    %14 = tpu.iota {dimensions = array<i32: 1>} : vector<16x8xi32>
    %c2_i32 = arith.constant 2 : i32
    %15 = vector.broadcast %c2_i32 : i32 to vector<16x1xi32>
    %16 = arith.addi %15, %13 : vector<16x1xi32>
    %17 = vector.broadcast %16 : vector<16x1xi32> to vector<16x8xi32>
    %18 = arith.cmpi eq, %14, %17 : vector<16x8xi32>
    %cst_9 = arith.constant 1.000000e+00 : f32
    %cst_10 = arith.constant 0.000000e+00 : f32
    %19 = vector.broadcast %cst_9 : f32 to vector<16x8xf32>
    %20 = vector.broadcast %cst_10 : f32 to vector<16x8xf32>
    %21 = arith.select %18, %19, %20 : vector<16x8xi1>, vector<16x8xf32>
    %c7_i32 = arith.constant 7 : i32
    %22 = vector.broadcast %c7_i32 : i32 to vector<16x8xi32>
    %23 = arith.cmpi eq, %14, %22 : vector<16x8xi32>
    %cst_11 = arith.constant 1.000000e+00 : f32
    %cst_12 = arith.constant 0.000000e+00 : f32
    %24 = vector.broadcast %cst_11 : f32 to vector<16x8xf32>
    %25 = vector.broadcast %cst_12 : f32 to vector<16x8xf32>
    %26 = arith.select %23, %24, %25 : vector<16x8xi1>, vector<16x8xf32>
    %27 = arith.addf %21, %26 : vector<16x8xf32>
    %c0_i32_13 = arith.constant 0 : i32
    %28 = vector.broadcast %c0_i32_13 : i32 to vector<16x8xi32>
    %29 = arith.cmpi eq, %14, %28 : vector<16x8xi32>
    %30 = vector.extract_strided_slice %4 {offsets = [0, 0], sizes = [16, 1], strides = [1, 1]} : vector<16x2xf32> to vector<16x1xf32>
    %cst_14 = arith.constant 0.000000e+00 : f32
    %31 = vector.shape_cast %30 : vector<16x1xf32> to vector<16x1xf32>
    %32 = vector.broadcast %31 : vector<16x1xf32> to vector<16x8xf32>
    %33 = vector.broadcast %cst_14 : f32 to vector<16x8xf32>
    %34 = arith.select %29, %32, %33 : vector<16x8xi1>, vector<16x8xf32>
    %35 = arith.addf %27, %34 : vector<16x8xf32>
    %c1_i32 = arith.constant 1 : i32
    %36 = vector.broadcast %c1_i32 : i32 to vector<16x8xi32>
    %37 = arith.cmpi eq, %14, %36 : vector<16x8xi32>
    %38 = vector.extract_strided_slice %4 {offsets = [0, 1], sizes = [16, 1], strides = [1, 1]} : vector<16x2xf32> to vector<16x1xf32>
    %cst_15 = arith.constant 0.000000e+00 : f32
    %39 = vector.shape_cast %38 : vector<16x1xf32> to vector<16x1xf32>
    %40 = vector.broadcast %39 : vector<16x1xf32> to vector<16x8xf32>
    %41 = vector.broadcast %cst_15 : f32 to vector<16x8xf32>
    %42 = arith.select %37, %40, %41 : vector<16x8xi1>, vector<16x8xf32>
    %43 = arith.addf %35, %42 : vector<16x8xf32>
    %c0_16 = arith.constant 0 : index
    %c0_17 = arith.constant 0 : index
    %44 = vector.load %arg5[%c0_16, %c0_17] : memref<8x384xf32, #tpu.memory_space<vmem>>, vector<8x384xf32>
    %cst_18 = arith.constant dense<0.000000e+00> : vector<16x384xf32>
    %45 = tpu.matmul %43, %44, %cst_18 {dimension_numbers = #tpu.dot_dimension_numbers<[1], [0], [0], [1], [0, 0, 1, 1], [], []>} : vector<16x8xf32>, vector<8x384xf32>, vector<16x384xf32> -> vector<16x384xf32>
    %c0_19 = arith.constant 0 : index
    %c0_20 = arith.constant 0 : index
    %46 = vector.load %arg8[%c0_19, %c0_20] : memref<16x128xf32, #tpu.memory_space<vmem>>, vector<16x128xf32>
    %47 = vector.broadcast %6 : vector<16x1xf32> to vector<16x128xf32>
    %48 = arith.mulf %47, %46 : vector<16x128xf32>
    %49 = arith.truncf %48 : vector<16x128xf32> to vector<16x128xbf16>
    %c0_21 = arith.constant 0 : index
    %c0_22 = arith.constant 0 : index
    %50 = vector.load %arg6[%c0_21, %c0_22] : memref<136x512xbf16, #tpu.memory_space<vmem>>, vector<128x384xbf16>
    %cst_23 = arith.constant dense<0.000000e+00> : vector<16x384xf32>
    %51 = tpu.matmul %49, %50, %cst_23 {dimension_numbers = #tpu.dot_dimension_numbers<[1], [0], [0], [1], [0, 0, 1, 1], [], []>} : vector<16x128xbf16>, vector<128x384xbf16>, vector<16x384xf32> -> vector<16x384xf32>
    %c128 = arith.constant 128 : index
    %c0_24 = arith.constant 0 : index
    %52 = vector.load %arg6[%c128, %c0_24] : memref<136x512xbf16, #tpu.memory_space<vmem>>, vector<1x384xbf16>
    %53 = arith.extf %52 : vector<1x384xbf16> to vector<1x384xf32>
    %54 = vector.broadcast %53 : vector<1x384xf32> to vector<16x384xf32>
    %55 = arith.addf %51, %54 : vector<16x384xf32>
    %56 = vector.extract_strided_slice %45 {offsets = [0, 0], sizes = [16, 128], strides = [1, 1]} : vector<16x384xf32> to vector<16x128xf32>
    %57 = vector.extract_strided_slice %55 {offsets = [0, 0], sizes = [16, 128], strides = [1, 1]} : vector<16x384xf32> to vector<16x128xf32>
    %58 = arith.addf %56, %57 : vector<16x128xf32>
    %59 = arith.negf %58 : vector<16x128xf32>
    %60 = math.exp %59 : vector<16x128xf32>
    %cst_25 = arith.constant 1.000000e+00 : f32
    %61 = vector.broadcast %cst_25 : f32 to vector<16x128xf32>
    %62 = arith.addf %61, %60 : vector<16x128xf32>
    %63 = arith.divf %61, %62 : vector<16x128xf32>
    %64 = vector.extract_strided_slice %45 {offsets = [0, 128], sizes = [16, 128], strides = [1, 1]} : vector<16x384xf32> to vector<16x128xf32>
    %65 = vector.extract_strided_slice %55 {offsets = [0, 128], sizes = [16, 128], strides = [1, 1]} : vector<16x384xf32> to vector<16x128xf32>
    %66 = arith.addf %64, %65 : vector<16x128xf32>
    %67 = arith.negf %66 : vector<16x128xf32>
    %68 = math.exp %67 : vector<16x128xf32>
    %cst_26 = arith.constant 1.000000e+00 : f32
    %69 = vector.broadcast %cst_26 : f32 to vector<16x128xf32>
    %70 = arith.addf %69, %68 : vector<16x128xf32>
    %71 = arith.divf %69, %70 : vector<16x128xf32>
    %72 = vector.extract_strided_slice %45 {offsets = [0, 256], sizes = [16, 128], strides = [1, 1]} : vector<16x384xf32> to vector<16x128xf32>
    %73 = vector.extract_strided_slice %55 {offsets = [0, 256], sizes = [16, 128], strides = [1, 1]} : vector<16x384xf32> to vector<16x128xf32>
    %74 = arith.mulf %63, %73 : vector<16x128xf32>
    %75 = arith.addf %72, %74 : vector<16x128xf32>
    %76 = math.tanh %75 : vector<16x128xf32>
    %cst_27 = arith.constant 1.000000e+00 : f32
    %77 = vector.broadcast %cst_27 : f32 to vector<16x128xf32>
    %78 = arith.subf %77, %71 : vector<16x128xf32>
    %79 = arith.mulf %78, %76 : vector<16x128xf32>
    %80 = arith.mulf %71, %48 : vector<16x128xf32>
    %81 = arith.addf %79, %80 : vector<16x128xf32>
    %c0_28 = arith.constant 0 : index
    %c0_29 = arith.constant 0 : index
    %82 = vector.load %arg8[%c0_28, %c0_29] : memref<16x128xf32, #tpu.memory_space<vmem>>, vector<16x128xf32>
    tpu.vector_store %arg8[%c0_28, %c0_29], %81 {strides = array<i32>} : memref<16x128xf32, #tpu.memory_space<vmem>>, vector<16x128xf32>,
    %83 = arith.truncf %81 : vector<16x128xf32> to vector<16x128xbf16>
    %c0_30 = arith.constant 0 : index
    %c384 = arith.constant 384 : index
    %84 = vector.load %arg6[%c0_30, %c384] : memref<136x512xbf16, #tpu.memory_space<vmem>>, vector<128x128xbf16>
    %cst_31 = arith.constant dense<0.000000e+00> : vector<16x128xf32>
    %85 = tpu.matmul %83, %84, %cst_31 {dimension_numbers = #tpu.dot_dimension_numbers<[1], [0], [0], [1], [0, 0, 1, 1], [], []>} : vector<16x128xbf16>, vector<128x128xbf16>, vector<16x128xf32> -> vector<16x128xf32>
    %c128_32 = arith.constant 128 : index
    %c384_33 = arith.constant 384 : index
    %86 = vector.load %arg6[%c128_32, %c384_33] : memref<136x512xbf16, #tpu.memory_space<vmem>>, vector<1x128xbf16>
    %87 = arith.extf %86 : vector<1x128xbf16> to vector<1x128xf32>
    %88 = vector.broadcast %87 : vector<1x128xf32> to vector<16x128xf32>
    %89 = arith.addf %85, %88 : vector<16x128xf32>
    %90 = tpu.iota {dimensions = array<i32: 1>} : vector<16x128xi32>
    %c8_i32 = arith.constant 8 : i32
    %91 = vector.broadcast %c8_i32 : i32 to vector<16x128xi32>
    %92 = arith.cmpi sge, %90, %91 : vector<16x128xi32>
    %c12_i32 = arith.constant 12 : i32
    %93 = vector.broadcast %c12_i32 : i32 to vector<16x128xi32>
    %94 = arith.cmpi slt, %90, %93 : vector<16x128xi32>
    %95 = arith.andi %92, %94 : vector<16x128xi1>
    %cst_34 = arith.constant 0xFF800000 : f32
    %96 = vector.broadcast %cst_34 : f32 to vector<16x128xf32>
    %97 = arith.select %95, %89, %96 : vector<16x128xi1>, vector<16x128xf32>
    %cst_35 = arith.constant dense<0xFF800000> : vector<16xf32>
    %98 = vector.multi_reduction <maximumf>, %97, %cst_35 [1] : vector<16x128xf32> to vector<16xf32>
    %99 = vector.shape_cast %98 : vector<16xf32> to vector<16x1xf32>
    %100 = vector.broadcast %99 : vector<16x1xf32> to vector<16x128xf32>
    %101 = arith.subf %97, %100 : vector<16x128xf32>
    %102 = math.exp %101 : vector<16x128xf32>
    %cst_36 = arith.constant dense<0.000000e+00> : vector<16xf32>
    %103 = vector.multi_reduction <add>, %102, %cst_36 [1] : vector<16x128xf32> to vector<16xf32>
    %104 = vector.shape_cast %103 : vector<16xf32> to vector<16x1xf32>
    %105 = math.log %104 : vector<16x1xf32>
    %cst_37 = arith.constant 0.000000e+00 : f32
    %106 = vector.broadcast %cst_37 : f32 to vector<16x1xf32>
    %107 = arith.subf %106, %105 : vector<16x1xf32>
    %108 = vector.broadcast %99 : vector<16x1xf32> to vector<16x128xf32>
    %109 = arith.cmpf oeq, %97, %108 : vector<16x128xf32>
    %c128_i32 = arith.constant 128 : i32
    %110 = vector.broadcast %c128_i32 : i32 to vector<16x128xi32>
    %111 = arith.select %109, %90, %110 : vector<16x128xi1>, vector<16x128xi32>
    %cst_38 = arith.constant dense<2147483647> : vector<16xi32>
    %112 = vector.multi_reduction <minsi>, %111, %cst_38 [1] : vector<16x128xi32> to vector<16xi32>
    %113 = vector.shape_cast %112 : vector<16xi32> to vector<16x1xi32>
    %c8_i32_39 = arith.constant 8 : i32
    %114 = vector.broadcast %c8_i32_39 : i32 to vector<16x1xi32>
    %115 = arith.subi %113, %114 : vector<16x1xi32>
    %116 = arith.sitofp %115 : vector<16x1xi32> to vector<16x1xf32>
    %c1_i32_40 = arith.constant 1 : i32
    %117 = vector.broadcast %c1_i32_40 : i32 to vector<16x128xi32>
    %118 = arith.cmpi eq, %90, %117 : vector<16x128xi32>
    %119 = vector.shape_cast %107 : vector<16x1xf32> to vector<16x1xf32>
    %120 = vector.broadcast %119 : vector<16x1xf32> to vector<16x128xf32>
    %121 = arith.select %118, %120, %89 : vector<16x128xi1>, vector<16x128xf32>
    %c2_i32_41 = arith.constant 2 : i32
    %122 = vector.broadcast %c2_i32_41 : i32 to vector<16x128xi32>
    %123 = arith.cmpi eq, %90, %122 : vector<16x128xi32>
    %124 = vector.shape_cast %116 : vector<16x1xf32> to vector<16x1xf32>
    %125 = vector.broadcast %124 : vector<16x1xf32> to vector<16x128xf32>
    %126 = arith.select %123, %125, %121 : vector<16x128xi1>, vector<16x128xf32>
    %c0_42 = arith.constant 0 : index
    %c0_43 = arith.constant 0 : index
    %c0_44 = arith.constant 0 : index
    %127 = vector.load %arg7[%c0_42, %c0_43, %c0_44] : memref<1x16x256xf32, #tpu.memory_space<vmem>>, vector<1x16x128xf32>
    %128 = vector.shape_cast %127 : vector<1x16x128xf32> to vector<16x128xf32>
    %129 = vector.shape_cast %81 : vector<16x128xf32> to vector<1x16x128xf32>
    tpu.vector_store %arg7[%c0_42, %c0_43, %c0_44], %129 {strides = array<i32>} : memref<1x16x256xf32, #tpu.memory_space<vmem>>, vector<1x16x128xf32>,
    %c0_45 = arith.constant 0 : index
    %c0_46 = arith.constant 0 : index
    %c128_47 = arith.constant 128 : index
    %130 = vector.load %arg7[%c0_45, %c0_46, %c128_47] : memref<1x16x256xf32, #tpu.memory_space<vmem>>, vector<1x16x128xf32>
    %131 = vector.shape_cast %130 : vector<1x16x128xf32> to vector<16x128xf32>
    %132 = vector.shape_cast %126 : vector<16x128xf32> to vector<1x16x128xf32>
    tpu.vector_store %arg7[%c0_45, %c0_46, %c128_47], %132 {strides = array<i32>} : memref<1x16x256xf32, #tpu.memory_space<vmem>>, vector<1x16x128xf32>,
    return
  }
  func.func @transform_0(%arg0: i32) -> (i32, i32, i32) {
    %c0_i32 = arith.constant 0 : i32
    %c0_i32_0 = arith.constant 0 : i32
    %c0_i32_1 = arith.constant 0 : i32
    return %arg0, %c0_i32, %c0_i32_0 : i32, i32, i32
  }
  func.func @transform_1(%arg0: i32) -> (i32, i32, i32) {
    %c0_i32 = arith.constant 0 : i32
    %c0_i32_0 = arith.constant 0 : i32
    %c0_i32_1 = arith.constant 0 : i32
    return %arg0, %c0_i32, %c0_i32_0 : i32, i32, i32
  }
  func.func @transform_2(%arg0: i32) -> (i32, i32, i32) {
    %c0_i32 = arith.constant 0 : i32
    %c0_i32_0 = arith.constant 0 : i32
    %c0_i32_1 = arith.constant 0 : i32
    return %arg0, %c0_i32, %c0_i32_0 : i32, i32, i32
  }
  func.func @transform_3(%arg0: i32) -> (i32, i32) {
    %c0_i32 = arith.constant 0 : i32
    %c0_i32_0 = arith.constant 0 : i32
    %c0_i32_1 = arith.constant 0 : i32
    return %c0_i32, %c0_i32_0 : i32, i32
  }
  func.func @transform_4(%arg0: i32) -> (i32, i32) {
    %c0_i32 = arith.constant 0 : i32
    %c0_i32_0 = arith.constant 0 : i32
    %c0_i32_1 = arith.constant 0 : i32
    return %c0_i32, %c0_i32_0 : i32, i32
  }
  func.func @transform_5(%arg0: i32) -> (i32, i32) {
    %c0_i32 = arith.constant 0 : i32
    %c0_i32_0 = arith.constant 0 : i32
    %c0_i32_1 = arith.constant 0 : i32
    return %c0_i32, %c0_i32_0 : i32, i32
  }
  func.func @transform_6(%arg0: i32) -> (i32, i32, i32) {
    %c0_i32 = arith.constant 0 : i32
    %c0_i32_0 = arith.constant 0 : i32
    %c0_i32_1 = arith.constant 0 : i32
    return %arg0, %c0_i32, %c0_i32_0 : i32, i32, i32
  }
}

</mosaic_0001>

<bundles_post_ra>
// kernel: policy_act_rollout.1
= control target key start
LH: loop header
LB: loop body
LE: loop exit
PB: predicated region body
PF: predicated region fallthrough
CT: control target
= control target key end

     0   :  { %11 = vsyncpa [#allocation4], 0  ;;  %s1444_s21 = smov 0   ;;  %s1609_s0 = inlined_call_operand.vmem [shape: f32[4,16,2], index: 0, kind: input, shape index: {}]   ;;  %s1610_s1 = inlined_call_operand.vmem [shape: s32[4,16,1], index: 1, kind: input, shape index: {}]   ;;  %s1611_s2 = inlined_call_operand.vmem [shape: f32[4,16,1], index: 2, kind: input, shape index: {}]   ;;  %s1612_s3 = inlined_call_operand.vmem [shape: f32[16,128], index: 3, kind: input, shape index: {}]   ;;  %s1613_s4 = inlined_call_operand.vmem [shape: f32[8,384], index: 4, kind: input, shape index: {}]   ;;  %s1614_s5 = inlined_call_operand.hbm [shape: bf16[136,512], index: 5, kind: input, shape index: {}]   ;;  %s1615_s6 = inlined_call_operand.vmem [shape: f32[4,16,256], index: 6, kind: output, shape index: {}]  }
   0x1 LB: > { %s1450_s22 = sadd.s32 4294967295, %s1400_s21   ;;  %p1133_p0 = scmp.ge.s32.totalorder %s1400_s21, 1  ;;  %s1400_s21 = sphi %s1444_s21, %s17_s21  }
   0x2   : > { %p189_p1 = scmp.lt.s32.totalorder %s1400_s21, 5  ;;  %s1402_s23 = smov [#allocation3]  }
   0x3   : > { %s207_s24 = sshll.u32 %s1402_s23, 4  ;;  %p1616_p4 = scmp.eq.s32.totalorder %s1450_s22, 0  ;;  %s208_s24 = int_to_ptr.vmem [resolvable:$true] %s207_s24 }
   0x4   : > { %p1455_p3 = pnand %p1133_p0, %p189_p1  ;;  %s1362_s29 = scalar_lea.hbm %s1614_s5, 4352 }
   0x5   : > { %p1363_p7 = scmp.ne.s32.totalorder %s1614_s5, %s1362_s29  ;;  %p1369_p11 = scmp.lt.u32.totalorder %s1362_s29, %s1614_s5 }
   0x6   : > { %s1618_s25 = scalar_select %p1455_p3, 1, 0 }
   0x7   : > { %p1269_p5 = pneg %p1455_p3 }
   0x9   : > { %p1464_p6 = pnand %p1616_p4, %p1269_p5 }
   0xb   : > { %p1364_p8 = pneg %p1464_p6 }
   0xd   : > { %p1365_p9 = pnand %p1364_p8, %p1363_p7 }
   0xf   : > { %p1366_p10 = pneg %p1365_p9 }
  0x11   : > { %p1371_p12 = pnand %p1369_p11, %p1366_p10 }
  0x13   : > { %1374 = shalt.err (!%p1371_p12)
}
  0x14   : > { %s1375_s10 = scalar_lea.vmem %s208_s24, 4352  ;;  %p1383_p5 = scmp.lt.s32.totalorder %s208_s24, %s208_s24 }
  0x15   : > { %p1376_p13 = scmp.ne.s32.totalorder %s208_s24, %s1375_s10  ;;  %p1384_p2 = scmp.lt.s32.totalorder %s1375_s10, %s1375_s10 }
  0x17   : > { %p1378_p0 = pnand %p1376_p13, %p1364_p8  ;;  %p1385_p4 = por %p1384_p2, %p1383_p5 }
  0x19   : > { %p1379_p1 = pneg %p1378_p0 }
  0x1b   : > { %p1386_p3 = pnand %p1385_p4, %p1379_p1 }
  0x1d   : > { %1389 = shalt.err (!%p1386_p3)
}
  0x1e   : > { %s1403_s11 = smov 256   ;;  %s1404_s12 = smov 16  }
  0x1f   : > { %1272 = dma.hbm_to_vmem [thread:$0]  (!%p1464_p6), %s1614_s5, 4352, %s208_s24, [#allocation4], %s1403_s11, %s1403_s11, %s1404_s12  }
  0x20   : > { %p1620_p7 = scmp.ne.s32.totalorder %s1618_s25, 0 }
  0x21   : > { %p1621_p9 = scmp.eq.s32.totalorder (!%p1620_p7), %s1450_s22, 0 }
  0x22   : > { %247 = sbr.rel (%p1620_p7) target bundleno = 1143 (0x477), region = 44 }
  0x29   : > { %1395 = dma.done.wait (%p1621_p9), [#allocation4], 4352   ;;  %p1622_p8 = pmov %p1621_p9 }
  0x2a   : > { %p287_p2 = scmp.lt.s32.totalorder %s1450_s22, 3  ;;  %p1623_p3 = scmp.ne.s32.totalorder %s1450_s22, 0 }
  0x2b   : > { %1397 = vsyncadd (%p1622_p8), [#allocation4], 4294962944  ;;  %v312_v0 = vld [vmem:[%s1612_s3] sm:$0xff] (!%p1623_p3)  ;;  %v313_v1 = vld [vmem:[%s1612_s3 + $0x8] sm:$0xff] (!%p1623_p3) }
  0x2c   : > { %s288_s15 = scalar_select %p287_p2, %s1450_s22, 3 }
  0x2d   : > { %311 = sbr.rel (%p1623_p3) target bundleno = 52 (0x34), region = 52  ;;  %314 = vst [vmem:[#allocation2] sm:$0xff] (!%p1623_p3), %v312_v0  ;;  %315 = vst [vmem:[#allocation2 + $0x8] sm:$0xff] (!%p1623_p3), %v313_v1 }
  0x2e   : > { %s1191_s16 = sshll.u32 %s288_s15, 4  ;;  %s1194_s17 = sshll.u32 %s288_s15, 5 }
  0x2f   : > { %s1495_s20 = scalar_lea.vmem %s1609_s0, %s1191_s16  ;;  %s296_s25 = scalar_lea.vmem %s1610_s1, %s1191_s16 }
  0x30   : > { %s301_s28 = scalar_lea.vmem %s1611_s2, %s1191_s16  ;;  %s1506_s7 = scalar_lea.vmem %s1615_s6, %s1194_s17 }
  0x34 PF: > { %v321_v2 = vld [vmem:[%s296_s25 + $0x8] sm:$0xff]  ;;  %v1405_v3 = vmov 0   ;;  %v318_v6 = vld [vmem:[%s301_s28] sm:$0xff]  ;;  %v1406_v10 = vmov 0.0   ;;  %v1407_v31 = vmov 1   ;;  %v378_v37 = vld [vmem:[%s1613_s4 + $0x10] sm:$0xff]  ;;  %v330_v42 = vlaneseq }
  0x35   : > { %1291 = vset.pattern.permute.xlu1 %v1405_v3  ;;  %1290 = vset.pattern.permute.xlu0 %v1405_v3  ;;  %v319_v4 = vld [vmem:[%s301_s28 + $0x8] sm:$0xff]  ;;  %v323_v5 = vcvt.s32.f32 %v321_v2  ;;  %v320_v7 = vld [vmem:[%s296_s25] sm:$0xff]  ;;  %vm379_vm5 = vcmask 64512   ;;  %vm1408_vm6 = vmmov 0  }
  0x36   : > { %v322_v8 = vcvt.s32.f32 %v320_v7  ;;  %v1294_v9 = vld [vmem:[#allocation3 + $0x4] ss:$16 sps:$4 sm:$0xff]   ;;  %450 = vmatprep.mubr.f32.mxu1 %v1406_v10  ;;  %762 = vmatprep.mubr.bf16.mxu0 %v1405_v3  ;;  %v1296_v12 = vld [vmem:[#allocation3] ss:$16 sps:$4 sm:$0xff]   ;;  %v317_v32 = vld [vmem:[%s1495_s20 + $0x8] sm:$0xff]  ;;  %v1534_v43 = vand.u32 127, %v330_v42 }
  0x37   : > { %v325_v11 = vadd.f32 1.0, %v323_v5  ;;  %730 = vmatprep.subr.bf16.mxu0 %v1294_v9  ;;  %v1297_v14 = vld [vmem:[#allocation3 + $0x24] ss:$16 sps:$4 sm:$0xff]   ;;  %v1299_v16 = vld [vmem:[#allocation3 + $0x20] ss:$16 sps:$4 sm:$0xff]   ;;  %v377_v35 = vld [vmem:[%s1613_s4 + $0x8] sm:$0xff] }
  0x38   : > { %v324_v13 = vadd.f32 1.0, %v322_v8  ;;  %731 = vmatpush1.bf16.msra.mxu0 %v1296_v12  ;;  %v1300_v18 = vld [vmem:[#allocation3 + $0x44] ss:$16 sps:$4 sm:$0xff]   ;;  %v1302_v20 = vld [vmem:[#allocation3 + $0x40] ss:$16 sps:$4 sm:$0xff]   ;;  %386 = vmatprep.subr.mxu1 %v377_v35  ;;  %vm344_vm0 = vcmp.eq.s32.totalorder %v1534_v43, 7 }
  0x39   : > { %v327_v15 = vmul.f32 %v325_v11, %v319_v4  ;;  %732 = vmatprep.subr.bf16.mxu0 %v1297_v14  ;;  %v1303_v22 = vld [vmem:[#allocation3 + $0x64] ss:$16 sps:$4 sm:$0xff]   ;;  %v1305_v26 = vld [vmem:[#allocation3 + $0x60] ss:$16 sps:$4 sm:$0xff]   ;;  %v345_v45 = vsel %vm344_vm0, 1.0, %v1406_v10  ;;  %vm348_vm3 = vcmp.eq.s32.totalorder %v1534_v43, 0 }
  0x3a   : > { %v326_v17 = vmul.f32 %v324_v13, %v318_v6  ;;  %v316_v28 = vld [vmem:[%s1495_s20] sm:$0xff]  ;;  %vm363_vm4 = vcmp.eq.s32.totalorder %v1534_v43, 1  ;;  %v539_v63 = vld [vmem:[#allocation2 + $0x8] sm:$0xff]  ;;  %vm970_vm7 = vcmp.ge.s32.totalorder %v1534_v43, 8  ;;  %vm971_vm8 = vcmp.lt.s32.totalorder %v1534_v43, 12 }
  0x3b   : > { %v1263_v19 = vtrunc.f32 %v327_v15  ;;  %v1306_v29 = vld [vmem:[#allocation3 + $0x84] ss:$16 sps:$4 sm:$0xff]   ;;  %v1308_v30 = vld [vmem:[#allocation3 + $0x80] ss:$16 sps:$4 sm:$0xff]   ;;  %v1318_v5 = vld [vmem:[#allocation3 + $0x8] ss:$16 sps:$4 sm:$0xff]  }
  0x3c   : > { %v1261_v21 = vtrunc.f32 %v326_v17  ;;  %733 = vmatpush1.bf16.msra.mxu0 %v1299_v16  ;;  %v1309_v33 = vld [vmem:[#allocation3 + $0xa4] ss:$16 sps:$4 sm:$0xff]   ;;  %v1311_v34 = vld [vmem:[#allocation3 + $0xa0] ss:$16 sps:$4 sm:$0xff]   ;;  %v1319_v7 = vld [vmem:[#allocation3 + $0x28] ss:$16 sps:$4 sm:$0xff]  }
  0x3d   : > { %v1264_v23 = vcvt.f32.s32 %v1263_v19  ;;  %734 = vmatprep.subr.bf16.mxu0 %v1300_v18  ;;  %v376_v36 = vld [vmem:[%s1613_s4] sm:$0xff]  ;;  %v1320_v8 = vld [vmem:[#allocation3 + $0x48] ss:$16 sps:$4 sm:$0xff]   ;;  %v1326_v15 = vld [vmem:[#allocation3 + $0xc] ss:$16 sps:$4 sm:$0xff]   ;;  %vm1033_vm14 = vcmp.eq.s32.totalorder %v1534_v43, 2 }
  0x3e   : > { %v1262_v24 = vcvt.f32.s32 %v1261_v21  ;;  %387 = vmatpush1.msra.mxu1 %v376_v36  ;;  %v1312_v38 = vld [vmem:[#allocation3 + $0xc4] ss:$16 sps:$4 sm:$0xff]   ;;  %v1314_v39 = vld [vmem:[#allocation3 + $0xc0] ss:$16 sps:$4 sm:$0xff]   ;;  %v1321_v9 = vld [vmem:[#allocation3 + $0x68] ss:$16 sps:$4 sm:$0xff]  }
  0x3f   : > { %v333_v25 = vadd.s32 2, %v1264_v23  ;;  %1216 = vmatprep.subr.mxu1 %v378_v37  ;;  %v1315_v40 = vld [vmem:[#allocation3 + $0xe4] ss:$16 sps:$4 sm:$0xff]   ;;  %v1317_v41 = vld [vmem:[#allocation3 + $0xe0] ss:$16 sps:$4 sm:$0xff]   ;;  %v591_v23 = vshrl.u32 %v330_v42, 7  ;;  %vm972_vm9 = vmand %vm970_vm7, %vm971_vm8 }
  0x40   : > { %v332_v27 = vadd.s32 2, %v1262_v24  ;;  %735 = vmatpush1.bf16.msra.mxu0 %v1302_v20  ;;  %v538_v62 = vld [vmem:[#allocation2] sm:$0xff]  ;;  %v1322_v11 = vld [vmem:[#allocation3 + $0x88] ss:$16 sps:$4 sm:$0xff]   ;;  %v1327_v16 = vld [vmem:[#allocation3 + $0x2c] ss:$16 sps:$4 sm:$0xff]  }
  0x41   : > { %338 = vperm.xlu1 %1291, %v333_v25   ;;  %736 = vmatprep.subr.bf16.mxu0 %v1303_v22  ;;  %v1323_v12 = vld [vmem:[#allocation3 + $0xa8] ss:$16 sps:$4 sm:$0xff]   ;;  %v1328_v17 = vld [vmem:[#allocation3 + $0x4c] ss:$16 sps:$4 sm:$0xff]   ;;  %v585_v24 = vld [vmem:[#allocation3 + $0x100] sm:$0x11] }
  0x42   : > { %335 = vperm.xlu0 %1290, %v332_v27   ;;  %v1324_v13 = vld [vmem:[#allocation3 + $0xc8] ss:$16 sps:$4 sm:$0xff]   ;;  %v1329_v18 = vld [vmem:[#allocation3 + $0x6c] ss:$16 sps:$4 sm:$0xff]   ;;  %v587_v27 = vunpack.c.l.bf16 %v585_v24 }
  0x43   : > { %v1325_v14 = vld [vmem:[#allocation3 + $0xe8] ss:$16 sps:$4 sm:$0xff]   ;;  %v1330_v19 = vld [vmem:[#allocation3 + $0x8c] ss:$16 sps:$4 sm:$0xff]  }
  0x44   : > { %737 = vmatpush1.bf16.msra.mxu0 %v1305_v26  ;;  %v1331_v20 = vld [vmem:[#allocation3 + $0xac] ss:$16 sps:$4 sm:$0xff]  }
  0x45   : > { %1292 = vset.pattern.permute.xlu1 %v1407_v31  ;;  %738 = vmatprep.subr.bf16.mxu0 %v1306_v29  ;;  %v1332_v21 = vld [vmem:[#allocation3 + $0xcc] ss:$16 sps:$4 sm:$0xff]   ;;  %v588_v29 = vunpack.c.h.bf16 %v585_v24 }
  0x46   : > { %351 = vperm.xlu0 %1290, %v316_v28   ;;  %365 = vperm.xlu1 %1292, %v316_v28   ;;  %v1333_v22 = vld [vmem:[#allocation3 + $0xec] ss:$16 sps:$4 sm:$0xff]   ;;  %v1577_v28 = vsub.s32 0, %v591_v23 }
  0x48   : > { %739 = vmatpush1.bf16.msra.mxu0 %v1308_v30 }
  0x49   : > { %740 = vmatprep.subr.bf16.mxu0 %v1309_v33  ;;  %v597_v33 = vrot.slane %v588_v29, %v1577_v28 }
  0x4a   : > { %356 = vperm.xlu0 %1290, %v317_v32   ;;  %369 = vperm.xlu1 %1292, %v317_v32   ;;  %v593_v32 = vrot.slane %v587_v27, %v1577_v28  ;;  %v875_v27 = vld [vmem:[#allocation3 + $0x10c] sm:$0x1] }
  0x4b   : > { %v876_v29 = vunpack.c.l.bf16 %v875_v27 }
  0x4c   : > { %741 = vmatpush1.bf16.msra.mxu0 %v1311_v34 }
  0x4d   : > { %742 = vmatprep.subr.bf16.mxu0 %v1312_v38 }
  0x4e   : > { %542 = vperm.xlu0 %1290, %v318_v6   ;;  %1293 = vset.pattern.permute.xlu1 %v1405_v3 }
  0x4f   : > { %547 = vperm.xlu1 %1293, %v319_v4  }
  0x50   : > { %743 = vmatpush1.bf16.msra.mxu0 %v1314_v39 }
  0x51   : > { %744 = vmatprep.subr.bf16.mxu0 %v1315_v40 }
  0x54   : > { %745 = vmatpush1.bf16.msra.mxu0 %v1317_v41 }
  0x55   : > { %1241 = vmatprep.subr.bf16.mxu0 %v1406_v10 }
  0xc0   : > { %v339_v44 = vpop.permute.xlu1 %338 }
  0xc1   : > { %v336_v46 = vpop.permute.xlu0 %335  ;;  %vm341_vm2 = vcmp.eq.s32.totalorder %v1534_v43, %v339_v44 }
  0xc2   : > { %vm340_vm1 = vcmp.eq.s32.totalorder %v1534_v43, %v336_v46  ;;  %v343_v51 = vsel %vm341_vm2, 1.0, %v1406_v10 }
  0xc3   : > { %v342_v47 = vsel %vm340_vm1, 1.0, %v1406_v10  ;;  %v347_v55 = vadd.f32 %v345_v45, %v343_v51 }
  0xc4   : > { %v346_v48 = vadd.f32 %v345_v45, %v342_v47 }
  0xc5   : > { %v352_v49 = vpop.permute.xlu0 %351  ;;  %v366_v50 = vpop.permute.xlu1 %365 }
  0xc6   : > { %v359_v52 = vsel %vm348_vm3, %v352_v49, 0.0  ;;  %v372_v53 = vsel %vm363_vm4, %v366_v50, 0.0 }
  0xc7   : > { %v361_v54 = vadd.f32 %v359_v52, %v346_v48 }
  0xc9   : > { %v374_v56 = vadd.f32 %v372_v53, %v361_v54  ;;  %v357_v57 = vpop.permute.xlu0 %356  ;;  %v370_v58 = vpop.permute.xlu1 %369 }
  0xca   : > { %v360_v59 = vsel %vm348_vm3, %v357_v57, 0.0  ;;  %v373_v60 = vsel %vm363_vm4, %v370_v58, 0.0 }
  0xcb   : > { %v362_v61 = vadd.f32 %v360_v59, %v347_v55  ;;  %1147 = vmatmul.mubr.msk.f32.vlgmr.msra.gmra.mrb[0].mxu1 %vm379_vm5, %v374_v56 }
  0xcc   : > { %1217 = vmatpush3.msra.mxu1 %v378_v37  ;;  %456 = vmatprep.mubr.f32.mxu1 %v1406_v10 }
  0xcd   : > { %v375_v0 = vadd.f32 %v373_v60, %v362_v61  ;;  %v543_v1 = vpop.permute.xlu0 %542  ;;  %1221 = vmatprep.subr.bf16.mxu1 %v1406_v10 }
  0xce   : > { %v548_v2 = vpop.permute.xlu1 %547  ;;  %v1551_v3 = vmul.f32 %v543_v1, %v538_v62 }
  0xcf   : > { %v1553_v4 = vmul.f32 %v548_v2, %v539_v63  ;;  %1148 = vmatmul.mubr.msk.f32.gmra.mrb[2].mxu1 %vm379_vm5, %v375_v0 }
  0xd0   : > { %1218 = vmatprep.mubr.msk.f32.mxu1 %vm379_vm5, %v374_v56  ;;  %v586_v56 = vld [vmem:[#allocation3 + $0x108] sm:$0x1] }
  0xd1   : > { %v552_v6 = vpack.c.bf16 %v1553_v4, %v1551_v3  ;;  %v589_v57 = vunpack.c.l.bf16 %v586_v56 }
  0xd3   : > { %1219 = vmatmul.mubr.msk.f32.vlgmr.msra.gmra.mrb[4].mxu1 %vm379_vm5, %v375_v0  ;;  %763 = vmatmul.mubr.bf16.vlgmr.msra.gmra.mrb[0].mxu0 %v552_v6  ;;  %v601_v59 = vrot.slane %v589_v57, %v1577_v28 }
  0xd4   : > { %1222 = vmatpush3.bf16.msra.mxu1 %v1318_v5  ;;  %1237 = vmatprep.mubr.msk.bf16.mxu1 %vm1408_vm6, %v1406_v10 }
  0xd5   : > { %1223 = vmatprep.subr.bf16.mxu1 %v1406_v10  ;;  %1257 = vmatprep.mubr.msk.bf16.mxu0 %vm1408_vm6, %v1406_v10 }
  0xd6   : > { %1242 = vmatpush3.bf16.msra.mxu0 %v1326_v15 }
  0xd7   : > { %1243 = vmatprep.subr.bf16.mxu0 %v1406_v10 }
  0xd8   : > { %1224 = vmatpush3.bf16.msra.mxu1 %v1319_v7 }
  0xd9   : > { %1225 = vmatprep.subr.bf16.mxu1 %v1406_v10 }
  0xda   : > { %1244 = vmatpush3.bf16.msra.mxu0 %v1327_v16 }
  0xdb   : > { %1245 = vmatprep.subr.bf16.mxu0 %v1406_v10 }
  0xdc   : > { %1226 = vmatpush3.bf16.msra.mxu1 %v1320_v8 }
  0xdd   : > { %1227 = vmatprep.subr.bf16.mxu1 %v1406_v10 }
  0xde   : > { %1246 = vmatpush3.bf16.msra.mxu0 %v1328_v17 }
  0xdf   : > { %1247 = vmatprep.subr.bf16.mxu0 %v1406_v10 }
  0xe0   : > { %1228 = vmatpush3.bf16.msra.mxu1 %v1321_v9 }
  0xe1   : > { %1229 = vmatprep.subr.bf16.mxu1 %v1406_v10 }
  0xe2   : > { %1248 = vmatpush3.bf16.msra.mxu0 %v1329_v18 }
  0xe3   : > { %1249 = vmatprep.subr.bf16.mxu0 %v1406_v10 }
  0xe4   : > { %1230 = vmatpush3.bf16.msra.mxu1 %v1322_v11 }
  0xe5   : > { %1231 = vmatprep.subr.bf16.mxu1 %v1406_v10 }
  0xe6   : > { %1250 = vmatpush3.bf16.msra.mxu0 %v1330_v19 }
  0xe7   : > { %1251 = vmatprep.subr.bf16.mxu0 %v1406_v10 }
  0xe8   : > { %1232 = vmatpush3.bf16.msra.mxu1 %v1323_v12 }
  0xe9   : > { %1233 = vmatprep.subr.bf16.mxu1 %v1406_v10 }
  0xea   : > { %1252 = vmatpush3.bf16.msra.mxu0 %v1331_v20 }
  0xeb   : > { %1253 = vmatprep.subr.bf16.mxu0 %v1406_v10 }
  0xec   : > { %1234 = vmatpush3.bf16.msra.mxu1 %v1324_v13 }
  0xed   : > { %1235 = vmatprep.subr.bf16.mxu1 %v1406_v10 }
  0xee   : > { %1254 = vmatpush3.bf16.msra.mxu0 %v1332_v21 }
  0xef   : > { %1255 = vmatprep.subr.bf16.mxu0 %v1406_v10 }
  0xf0   : > { %1236 = vmatpush3.bf16.msra.mxu1 %v1325_v14 }
  0xf2   : > { %1256 = vmatpush3.bf16.msra.mxu0 %v1333_v22 }
  0xf3   : > { %1238 = vmatmul.mubr.bf16.vlgmr.msra.gmra.mrb[8].mxu1 %v552_v6 }
 0x19e   : > { %v452_v25 = vpop.f32.mrb[0].mxu1 }
 0x19f   : > { %v454_v26 = vpop.f32.mrb[1].mxu1 }
 0x1a2   : > { %v458_v30 = vpop.f32.mrb[2].mxu1 }
 0x1a3   : > { %v460_v31 = vpop.f32.mrb[3].mxu1 }
 0x1a6   : > { %v1220_v34 = vpop.f32.mrb[4].mxu1  ;;  %v764_v35 = vpop.f32.mrb[0].mxu0 }
 0x1a7   : > { %v529_v36 = vpop.f32.mrb[5].mxu1  ;;  %v765_v10 = vadd.f32 %v764_v35, %v593_v32  ;;  %v766_v37 = vpop.f32.mrb[1].mxu0 }
 0x1a8   : > { %v767_v38 = vadd.f32 %v766_v37, %v597_v33  ;;  %v768_v39 = vpop.f32.mrb[2].mxu0 }
 0x1a9   : > { %v814_v40 = vadd.f32 %v765_v10, %v452_v25  ;;  %v769_v41 = vadd.f32 %v768_v39, %v593_v32  ;;  %v770_v42 = vpop.f32.mrb[3].mxu0 }
 0x1aa   : > { %v828_v44 = vadd.f32 %v767_v38, %v454_v26  ;;  %v771_v45 = vadd.f32 %v770_v42, %v597_v33 }
 0x1ab   : > { %v1175_v46 = vmul.f32 -1.442695, %v814_v40  ;;  %v815_v47 = vadd.f32 %v769_v41, %v458_v30  ;;  %v880_v30 = vrot.slane %v876_v29, %v1577_v28 }
 0x1ac   : > { %v829_v48 = vadd.f32 %v771_v45, %v460_v31  ;;  %v1177_v50 = vmul.f32 -1.442695, %v828_v44 }
 0x1ad   : > { %1334 = vpow2.f32 %v1175_v46  ;;  %v1176_v49 = vmul.f32 -1.442695, %v815_v47 }
 0x1ae   : > { %v1178_v51 = vmul.f32 -1.442695, %v829_v48 }
 0x1af   : > { %1336 = vpow2.f32 %v1176_v49 }
 0x1b0   : > { %1338 = vpow2.f32 %v1177_v50 }
 0x1b1   : > { %1340 = vpow2.f32 %v1178_v51 }
 0x1b7   : > { %v1335_v52 = vpop.eup %1334 }
 0x1b8   : > { %v822_v54 = vadd.f32 1.0, %v1335_v52 }
 0x1b9   : > { %v1337_v53 = vpop.eup %1336 }
 0x1ba   : > { %v823_v55 = vadd.f32 1.0, %v1337_v53  ;;  %1342 = vrcp.f32 %v822_v54  ;;  %v1339_v58 = vpop.eup %1338 }
 0x1bb   : > { %v1341_v60 = vpop.eup %1340  ;;  %v836_v61 = vadd.f32 1.0, %v1339_v58 }
 0x1bc   : > { %1344 = vrcp.f32 %v823_v55  ;;  %v837_v63 = vadd.f32 1.0, %v1341_v60 }
 0x1bd   : > { %1346 = vrcp.f32 %v836_v61 }
 0x1be   : > { %1348 = vrcp.f32 %v837_v63 }
 0x1c4   : > { %v1343_v2 = vpop.eup %1342 }
 0x1c6   : > { %v807_v62 = vpop.f32.mrb[8].mxu1  ;;  %v1345_v9 = vpop.eup %1344 }
 0x1c7   : > { %v808_v0 = vadd.f32 %v807_v62, %v601_v59  ;;  %v1239_v1 = vpop.f32.mrb[9].mxu1  ;;  %v1347_v14 = vpop.eup %1346 }
 0x1c8   : > { %v810_v5 = vpop.f32.mrb[10].mxu1  ;;  %v1349_v15 = vpop.eup %1348  ;;  %v848_v16 = vsub.f32 1.0, %v1347_v14  ;;  %v852_v20 = vmul.f32 %v1347_v14, %v1551_v3 }
 0x1c9   : > { %v842_v6 = vmul.f32 %v1343_v2, %v808_v0  ;;  %v811_v7 = vadd.f32 %v810_v5, %v601_v59  ;;  %v1240_v8 = vpop.f32.mrb[11].mxu1  ;;  %v849_v18 = vsub.f32 1.0, %v1349_v15  ;;  %v853_v23 = vmul.f32 %v1349_v15, %v1553_v4 }
 0x1cb   : > { %v844_v11 = vadd.f32 %v842_v6, %v529_v36  ;;  %v843_v12 = vmul.f32 %v1345_v9, %v811_v7 }
 0x1cd   : > { %1350 = vtanh.f32 %v844_v11  ;;  %v845_v13 = vadd.f32 %v1220_v34, %v843_v12 }
 0x1cf   : > { %1352 = vtanh.f32 %v845_v13 }
 0x1d7   : > { %v1351_v17 = vpop.eup %1350 }
 0x1d8   : > { %v850_v19 = vmul.f32 %v1351_v17, %v848_v16 }
 0x1d9   : > { %v1353_v21 = vpop.eup %1352 }
 0x1da   : > { %v851_v22 = vmul.f32 %v1353_v21, %v849_v18  ;;  %v854_v24 = vadd.f32 %v852_v20, %v850_v19 }
 0x1dc   : > { %v855_v25 = vadd.f32 %v853_v23, %v851_v22  ;;  %856 = vst [vmem:[#allocation2] sm:$0xff] %v854_v24  ;;  %1036 = vst [vmem:[%s1506_s7] sm:$0xff] %v854_v24 }
 0x1de   : > { %857 = vst [vmem:[#allocation2 + $0x8] sm:$0xff] %v855_v25  ;;  %v858_v26 = vpack.c.bf16 %v855_v25, %v854_v24  ;;  %1037 = vst [vmem:[%s1506_s7 + $0x10] sm:$0xff] %v855_v25 }
 0x1e0   : > { %1258 = vmatmul.mubr.bf16.vlgmr.msra.gmra.mrb[4].mxu0 %v858_v26 }
 0x2b3   : > { %v963_v3 = vpop.f32.mrb[4].mxu0 }
 0x2b4   : > { %v1589_v31 = vadd.f32 %v963_v3, %v880_v30  ;;  %v1259_v4 = vpop.f32.mrb[5].mxu0 }
 0x2b5   : > { %v966_v32 = vpop.f32.mrb[6].mxu0 }
 0x2b6   : > { %v1591_v33 = vadd.f32 %v966_v32, %v880_v30  ;;  %v1260_v34 = vpop.f32.mrb[7].mxu0  ;;  %v973_v35 = vsel %vm972_vm9, %v1589_v31, -inf }
 0x2b7   : > { %975 = vmax.xlane.f32.xlu0 %v973_v35 }
 0x2b8   : > { %v974_v36 = vsel %vm972_vm9, %v1591_v33, -inf }
 0x2b9   : > { %977 = vmax.xlane.f32.xlu1 %v974_v36 }
 0x344   : > { %v976_v28 = vpop.xlane.xlu0 %975 }
 0x345   : > { %v979_v10 = vsub.f32 %v973_v35, %v976_v28  ;;  %vm995_vm10 = vcmp.eq.f32.partialorder %v973_v35, %v976_v28 }
 0x346   : > { %v997_v37 = vsel %vm995_vm10, %v1534_v43, 128  ;;  %v978_v38 = vpop.xlane.xlu1 %977 }
 0x347   : > { %v981_v39 = vmul.f32 1.442695, %v979_v10  ;;  %v980_v40 = vsub.f32 %v974_v36, %v978_v38  ;;  %vm996_vm11 = vcmp.eq.f32.partialorder %v974_v36, %v978_v38  ;;  %v1000_v41 = vshra.s32 %v997_v37, 16 }
 0x348   : > { %v998_v42 = vsel %vm996_vm11, %v1534_v43, 128  ;;  %v999_v50 = vand.u32 65535, %v997_v37 }
 0x349   : > { %1354 = vpow2.f32 %v981_v39  ;;  %v983_v44 = vmul.f32 1.442695, %v980_v40  ;;  %v1002_v45 = vcvt.s32.f32 %v1000_v41  ;;  %v1014_v46 = vshra.s32 %v998_v42, 16 }
 0x34a   : > { %v1001_v52 = vcvt.s32.f32 %v999_v50  ;;  %v1013_v53 = vand.u32 65535, %v998_v42 }
 0x34b   : > { %1356 = vpow2.f32 %v983_v44  ;;  %1003 = vmin.xlane.f32.xlu0 %v1002_v45  ;;  %v1016_v47 = vcvt.s32.f32 %v1014_v46 }
 0x34c   : > { %v1015_v56 = vcvt.s32.f32 %v1013_v53 }
 0x34f   : > { %1017 = vmin.xlane.f32.xlu0 %v1016_v47 }
 0x353   : > { %v1355_v48 = vpop.eup %1354 }
 0x354   : > { %985 = vadd.xlane.f32.xlu1 %v1355_v48 }
 0x355   : > { %v1357_v49 = vpop.eup %1356 }
 0x356   : > { %987 = vadd.xlane.f32.xlu0 %v1357_v49 }
 0x3d8   : > { %v1004_v51 = vpop.xlane.xlu0 %1003 }
 0x3d9   : > { %vm1005_vm12 = vcmp.eq.f32.partialorder %v1002_v45, %v1004_v51  ;;  %v1010_v61 = vcvt.f32.s32 %v1004_v51 }
 0x3da   : > { %v1006_v54 = vsel %vm1005_vm12, %v1001_v52, inf }
 0x3db   : > { %1007 = vmin.xlane.f32.xlu1 %v1006_v54  ;;  %v1011_v1 = vshll.u32 %v1010_v61, 16 }
 0x3dc   : > { %v1018_v55 = vpop.xlane.xlu0 %1017 }
 0x3dd   : > { %vm1019_vm13 = vcmp.eq.f32.partialorder %v1016_v47, %v1018_v55  ;;  %v1024_v2 = vcvt.f32.s32 %v1018_v55 }
 0x3de   : > { %v1020_v57 = vsel %vm1019_vm13, %v1015_v56, inf }
 0x3df   : > { %1021 = vmin.xlane.f32.xlu0 %v1020_v57  ;;  %v1025_v11 = vshll.u32 %v1024_v2, 16 }
 0x3e1   : > { %v986_v58 = vpop.xlane.xlu1 %985 }
 0x3e2   : > { %1358 = vlog2.f32 %v986_v58 }
 0x3e3   : > { %v988_v59 = vpop.xlane.xlu0 %987 }
 0x3e4   : > { %1360 = vlog2.f32 %v988_v59 }
 0x3ec   : > { %v1359_v60 = vpop.eup %1358 }
 0x3ed   : > { %v990_v62 = vmul.f32 0.6931472, %v1359_v60 }
 0x3ee   : > { %v1361_v0 = vpop.eup %1360 }
 0x3ef   : > { %v993_v7 = vsub.f32 0.0, %v990_v62  ;;  %v992_v8 = vmul.f32 0.6931472, %v1361_v0 }
 0x3f1   : > { %v1031_v16 = vsel %vm363_vm4, %v993_v7, %v1589_v31  ;;  %v994_v17 = vsub.f32 0.0, %v992_v8 }
 0x3f3   : > { %v1032_v21 = vsel %vm363_vm4, %v994_v17, %v1591_v33 }
 0x468   : > { %v1008_v63 = vpop.xlane.xlu1 %1007 }
 0x469   : > { %v1009_v5 = vcvt.f32.s32 %v1008_v63 }
 0x46b   : > { %v1012_v6 = vadd.s32 %v1011_v1, %v1009_v5 }
 0x46c   : > { %v1022_v9 = vpop.xlane.xlu0 %1021 }
 0x46d   : > { %v1187_v12 = vadd.s32 4294967288, %v1012_v6  ;;  %v1023_v13 = vcvt.f32.s32 %v1022_v9 }
 0x46f   : > { %v1029_v14 = vcvt.s32.f32 %v1187_v12  ;;  %v1026_v15 = vadd.s32 %v1025_v11, %v1023_v13 }
 0x471   : > { %v1034_v18 = vsel %vm1033_vm14, %v1029_v14, %v1031_v16  ;;  %v1188_v19 = vadd.s32 4294967288, %v1026_v15 }
 0x472   : > { %1038 = vst [vmem:[%s1506_s7 + $0x8] sm:$0xff] %v1034_v18 }
 0x473   : > { %v1030_v20 = vcvt.s32.f32 %v1188_v19 }
 0x475   : > { %v1035_v22 = vsel %vm1033_vm14, %v1030_v20, %v1032_v21 }
 0x476   : > { %1039 = vst [vmem:[%s1506_s7 + $0x18] sm:$0xff] %v1035_v22 }
 0x477 PF: > { %s17_s21 = sadd.s32 1, %s1400_s21  }
 0x478   : > { %p14_p4 = scmp.ge.s32.totalorder %s17_s21, 6  }
 0x47a   :  { %16 = sbr.rel (!%p14_p4) target bundleno = 1 (0x1), region = 89 }
 0x481   :  { %1061 = vsyncpa [#allocation4], 1 }
 0x482   :  { %1063 = vsyncpa [#allocation4 + $0x1], 1 }

</bundles_post_ra>
